<compile_context>
chip_gen: v7x
topology: tpu7x:2x2x1
jax: 0.10.0
libtpu: 0.0.40
codegen_flags: <defaults>
</compile_context>

<pallas_src>
import functools

import jax
import jax.numpy as jnp
from jax.experimental import pallas as pl
from jax.experimental.pallas import tpu as pltpu

_LANE = 128
_SUBLANE = 8


def _round_up(x, m):
    return ((x + m - 1) // m) * m


def _cdiv(a, b):
    return (a + b - 1) // b


def _linear_kernel(x_ref, w_ref, b_ref, o_ref):
    # x_ref: [TM, F]      VMEM (streamed per grid step)
    # w_ref: [F, O_pad]   VMEM (lane-padded with zeros at param-prep; resident)
    # b_ref: [1, O]       VMEM (resident)
    # o_ref: [TM, O]      VMEM (compact output, O == num_labels == 2)
    o = o_ref.shape[-1]
    acc = jnp.dot(x_ref[...], w_ref[...], preferred_element_type=jnp.float32)
    o_ref[...] = (acc[:, :o] + b_ref[...]).astype(o_ref.dtype)


def _vmem_bytes(tm, f, o):
    # Conservative VMEM footprint: x and out double-buffered, weight/bias
    # counted at 2x; all sizes lane-padded as they sit in VMEM (f32).
    f_pad = _round_up(f, _LANE)
    o_pad = _round_up(o, _LANE)
    return 4 * (2 * tm * f_pad
                + 2 * tm * o_pad
                + 2 * _round_up(f, _SUBLANE) * o_pad
                + 2 * _SUBLANE * o_pad)


def _choose_tile(b, f, o, block_b):
    # Keep >= 2 grid steps for v7x's two TensorCores on large batches.
    tm = min(block_b, _round_up(_cdiv(b, 2), _SUBLANE))
    tm = max(tm, _SUBLANE)
    budget = 40 << 20  # double-buffer headroom under v7x's 64 MiB physical VMEM
    while tm > _SUBLANE and _vmem_bytes(tm, f, o) > budget:
        tm = max(_SUBLANE, _round_up(tm // 2, _SUBLANE))
    return tm


def _vmem_limit(tm, f, o):
    # At least the v5e scoped default (16 MiB), at most well under v7x's 64 MiB.
    return int(min(max(_vmem_bytes(tm, f, o) + (2 << 20), 16 << 20), 56 << 20))


@functools.partial(jax.jit, static_argnames=("block_b",))
def linear_bc_forward(x, w_pad, b, *, block_b=2048):
    """y = x @ W^T + b, i.e. torch.nn.Linear(input_shape, 2).forward(x).

    w_pad: [F, round_up(O, 128)] transposed weight, zero-padded on the lane
           axis at parameter-prep time (see pack_linear_bc_weight).
    b:     [O] bias.
    """
    B, F = x.shape
    O = b.shape[0]
    assert w_pad.shape == (F, _round_up(O, _LANE))

    b2d = b.reshape(1, O).astype(jnp.float32)
    vmem = pltpu.MemorySpace.VMEM

    if B <= block_b:
        # Whole problem fits in VMEM: no grid, no pipeline setup.
        return pl.pallas_call(
            _linear_kernel,
            out_shape=jax.ShapeDtypeStruct((B, O), x.dtype),
            in_specs=[
                pl.BlockSpec(memory_space=vmem),   # x
                pl.BlockSpec(memory_space=vmem),   # padded weight
                pl.BlockSpec(memory_space=vmem),   # bias
            ],
            out_specs=pl.BlockSpec(memory_space=vmem),
            compiler_params=pltpu.CompilerParams(
                vmem_limit_bytes=_vmem_limit(_round_up(B, _SUBLANE), F, O)),
        )(x, w_pad, b2d)

    # Large batch: tile only the batch axis. Weight & bias stay VMEM-resident
    # (constant index_map -> no re-DMA); x is streamed, output written compact.
    tm = _choose_tile(B, F, O, block_b)
    return pl.pallas_call(
        _linear_kernel,
        out_shape=jax.ShapeDtypeStruct((B, O), x.dtype),
        grid=(pl.cdiv(B, tm),),
        in_specs=[
            pl.BlockSpec((tm, F), lambda i: (i, 0)),               # x tile
            pl.BlockSpec((F, w_pad.shape[1]), lambda i: (0, 0)),   # resident W
            pl.BlockSpec((1, O), lambda i: (0, 0)),                # resident b
        ],
        out_specs=pl.BlockSpec((tm, O), lambda i: (i, 0)),
        compiler_params=pltpu.CompilerParams(
            dimension_semantics=("parallel",),
            vmem_limit_bytes=_vmem_limit(tm, F, O),
        ),
    )(x, w_pad, b2d)


def pack_linear_bc_weight(w_t):
    """One-time parameter prep: zero-pad [F, O] transposed weight to 128 lanes."""
    f, o = w_t.shape
    return jnp.pad(w_t, ((0, 0), (0, _round_up(o, _LANE) - o)))


def init_linear_bc_params(key, input_shape, num_labels=2, dtype=jnp.float32):
    """Deterministic init mirroring nn.Linear's default (uniform +/- 1/sqrt(fan_in))."""
    kw, kb = jax.random.split(key)
    bound = 1.0 / jnp.sqrt(jnp.array(input_shape, dtype=jnp.float32))
    # PyTorch stores weight as [out, in]; we keep the transposed [in, out] layout.
    w_t = jax.random.uniform(kw, (input_shape, num_labels), dtype, -bound, bound)
    b = jax.random.uniform(kb, (num_labels,), dtype, -bound, bound)
    return w_t, b


if __name__ == "__main__":
    key = jax.random.PRNGKey(0)
    k_x, k_p, k_x2 = jax.random.split(key, 3)

    input_shape = 32  # feature dimension fed into fc1
    num_labels = 2

    w_t, b = init_linear_bc_params(k_p, input_shape, num_labels)
    w_pad = pack_linear_bc_weight(w_t)   # parameter-prep time, not per call

    # Small batch -> grid-free single-block path.
    x_small = jax.random.normal(k_x, (8, input_shape), dtype=jnp.float32)
    y_small = jax.block_until_ready(linear_bc_forward(x_small, w_pad, b))
    ref_small = x_small @ w_t + b[None, :]
    assert y_small.shape == (8, num_labels)
    assert jnp.allclose(y_small, ref_small, atol=1e-5, rtol=1e-5)

    # Larger batch -> batch-tiled path (resident weight, >= 2 parallel steps).
    x_big = jax.random.normal(k_x2, (4096, input_shape), dtype=jnp.float32)
    y_big = jax.block_until_ready(linear_bc_forward(x_big, w_pad, b))
    ref_big = x_big @ w_t + b[None, :]
    assert y_big.shape == (4096, num_labels)
    assert jnp.allclose(y_big, ref_big, atol=1e-4, rtol=1e-4)

    print("KERNEL_OK")
</pallas_src>

<mosaic_0001>
module attributes {stable_mosaic.version = 11 : i64} {
  func.func @_linear_kernel(%arg0: memref<8x32xf32, #tpu.memory_space<vmem>>, %arg1: memref<32x128xf32, #tpu.memory_space<vmem>>, %arg2: memref<1x2xf32, #tpu.memory_space<vmem>>, %arg3: memref<8x2xf32, #tpu.memory_space<vmem>>) attributes {dimension_semantics = [], scalar_prefetch = 0 : i64, scratch_operands = 0 : i64, tpu.core_type = #tpu.core_type<tc>} {
    %c0 = arith.constant 0 : index
    %c0_0 = arith.constant 0 : index
    %0 = vector.load %arg0[%c0, %c0_0] : memref<8x32xf32, #tpu.memory_space<vmem>>, vector<8x32xf32>
    %c0_1 = arith.constant 0 : index
    %c0_2 = arith.constant 0 : index
    %1 = vector.load %arg1[%c0_1, %c0_2] : memref<32x128xf32, #tpu.memory_space<vmem>>, vector<32x128xf32>
    %cst = arith.constant dense<0.000000e+00> : vector<8x128xf32>
    %2 = tpu.matmul %0, %1, %cst {dimension_numbers = #tpu.dot_dimension_numbers<[1], [0], [0], [1], [0, 0, 1, 1], [], []>} : vector<8x32xf32>, vector<32x128xf32>, vector<8x128xf32> -> vector<8x128xf32>
    %3 = vector.extract_strided_slice %2 {offsets = [0, 0], sizes = [8, 2], strides = [1, 1]} : vector<8x128xf32> to vector<8x2xf32>
    %c0_3 = arith.constant 0 : index
    %c0_4 = arith.constant 0 : index
    %4 = vector.load %arg2[%c0_3, %c0_4] : memref<1x2xf32, #tpu.memory_space<vmem>>, vector<1x2xf32>
    %5 = vector.broadcast %4 : vector<1x2xf32> to vector<8x2xf32>
    %6 = arith.addf %3, %5 : vector<8x2xf32>
    %c0_5 = arith.constant 0 : index
    %c0_6 = arith.constant 0 : index
    %7 = vector.load %arg3[%c0_5, %c0_6] : memref<8x2xf32, #tpu.memory_space<vmem>>, vector<8x2xf32>
    tpu.vector_store %arg3[%c0_5, %c0_6], %6 {strides = array<i32>} : memref<8x2xf32, #tpu.memory_space<vmem>>, vector<8x2xf32>,
    return
  }
}

</mosaic_0001>

<bundles_post_ra>
// kernel: linear_bc_forward.1
= control target key start
LH: loop header
LB: loop body
LE: loop exit
PB: predicated region body
PF: predicated region fallthrough
CT: control target
= control target key end

     0   :  { %8 = vsyncpa [#allocation3], 0  ;;  %s278_s0 = inlined_call_operand.hbm [shape: f32[8,32], index: 0, kind: input, shape index: {}]   ;;  %s279_s1 = inlined_call_operand.hbm [shape: f32[32,128], index: 1, kind: input, shape index: {}]   ;;  %s280_s2 = inlined_call_operand.vmem [shape: f32[1,2], index: 2, kind: input, shape index: {}]   ;;  %s281_s3 = inlined_call_operand.vmem [shape: f32[8,2], index: 3, kind: output, shape index: {}]  }
   0x1   :  { %9 = vsyncpa [#allocation5], 0  ;;  %s214_s12 = smov [#allocation2]   ;;  %s215_s14 = smov [#allocation4]  }
   0x2   :  { %s16_s13 = sshll.u32 %s214_s12, 4  ;;  %s25_s15 = sshll.u32 %s215_s14, 4  ;;  %s17_s13 = int_to_ptr.vmem [resolvable:$true] %s16_s13  ;;  %s241_s15 = int_to_ptr.vmem [resolvable:$true] %s25_s15 }
   0x3   :  { %s166_s18 = scalar_lea.hbm %s278_s0, 128 }
   0x4   :  { %p167_p0 = scmp.ne.s32.totalorder %s278_s0, %s166_s18  ;;  %p170_p1 = scmp.lt.u32.totalorder %s166_s18, %s278_s0 }
   0x6   :  { %p172_p2 = pnand %p170_p1, %p167_p0 }
   0x8   :  { %175 = shalt.err (!%p172_p2)
}
   0x9   :  { %s176_s23 = scalar_lea.vmem %s17_s13, 128  ;;  %p181_p4 = scmp.lt.s32.totalorder %s17_s13, %s17_s13 }
   0xa   :  { %p177_p3 = scmp.ne.s32.totalorder %s17_s13, %s176_s23  ;;  %p182_p5 = scmp.lt.s32.totalorder %s176_s23, %s176_s23 }
   0xc   :  { %p183_p6 = por %p182_p5, %p181_p4 }
   0xe   :  { %p184_p7 = pnand %p183_p6, %p177_p3 }
  0x10   :  { %187 = shalt.err (!%p184_p7)
}
  0x11   :  { %19 = dma.hbm_to_vmem [thread:$0]  %s278_s0, 128, %s17_s13, [#allocation3]  }
  0x12   :  { %s188_s28 = scalar_lea.hbm %s279_s1, 512 }
  0x13   :  { %p189_p8 = scmp.ne.s32.totalorder %s279_s1, %s188_s28  ;;  %p192_p9 = scmp.lt.u32.totalorder %s188_s28, %s279_s1 }
  0x15   :  { %p194_p10 = pnand %p192_p9, %p189_p8 }
  0x17   :  { %197 = shalt.err (!%p194_p10)
}
  0x18   :  { %s198_s6 = scalar_lea.vmem %s241_s15, 512  ;;  %p203_p12 = scmp.lt.s32.totalorder %s241_s15, %s241_s15 }
  0x19   :  { %p199_p11 = scmp.ne.s32.totalorder %s241_s15, %s198_s6  ;;  %p204_p13 = scmp.lt.s32.totalorder %s198_s6, %s198_s6 }
  0x1b   :  { %p205_p0 = por %p204_p13, %p203_p12 }
  0x1d   :  { %p206_p1 = pnand %p205_p0, %p199_p11 }
  0x1f   :  { %209 = shalt.err (!%p206_p1)
}
  0x20   :  { %s216_s0 = smov 128   ;;  %s217_s7 = smov 8  }
  0x21   :  { %31 = dma.hbm_to_vmem [thread:$0]  %s279_s1, 512, %s241_s15, [#allocation5], %s216_s0, %s216_s0, %s217_s7  }
  0x22   :  { %210 = dma.done.wait [#allocation3], 128  }
  0x23   :  { %211 = vsyncadd [#allocation3], 4294967168 }
  0x24   :  { %212 = dma.done.wait [#allocation5], 512  }
  0x25   :  { %213 = vsyncadd [#allocation5], 4294966784  ;;  %v218_v0 = vmov 0.0|0.0   ;;  %vm219_vm0 = vmmov 0   ;;  %v220_v1 = vmov 0.0   ;;  %v41_v2 = vld [vmem:[#allocation4] sm:$0xff] }
  0x26   :  { %153 = vmatprep.subr.bf16.mxu0 %v218_v0  ;;  %150 = vmatprep.mubr.msk.f32.mxu0 %vm219_vm0, %v220_v1  ;;  %v42_v3 = vld [vmem:[#allocation4 + $0x8] sm:$0xff]  ;;  %v43_v4 = vld [vmem:[#allocation4 + $0x10] sm:$0xff]  ;;  %v44_v6 = vld [vmem:[#allocation4 + $0x18] sm:$0xff]  ;;  %vm45_vm1 = vcmask 261120   ;;  %vm127_vm2 = vcmask 15360  }
  0x27   :  { %v154_v5 = vpack.c.bf16 %v42_v3, %v41_v2  ;;  %v157_v7 = vpack.c.bf16 %v44_v6, %v43_v4  ;;  %v40_v8 = vld [vmem:[#allocation2] sm:$0xff] }
  0x28   :  { %v136_v9 = vld [vmem:[%s280_s2] ss:$0 sm:$0xff] }
  0x29   :  { %155 = vmatpush3.bf16.msra.mxu0 %v154_v5 }
  0x2a   :  { %156 = vmatprep.subr.bf16.mxu0 %v218_v0 }
  0x2d   :  { %158 = vmatpush3.bf16.msra.mxu0 %v157_v7 }
  0x30   :  { %151 = vmatmul.mubr.msk.f32.vlgmr.msra.gmra.mrb[0].mxu0 %vm45_vm1, %v40_v8 }
 0x103   :  { %v115_v10 = vpop.f32.mrb[0].mxu0 }
 0x104   :  { %v126_v11 = vadd.f32 %v136_v9, %v115_v10  ;;  %v152_v12 = vpop.f32.mrb[1].mxu0 }
 0x106   :  { %128 = vst.msk [vmem:[%s281_s3] sm:$0xff] %vm127_vm2, %v126_v11 }
 0x107   :  { %133 = vsyncpa [#allocation3], 1 }
 0x108   :  { %134 = vsyncpa [#allocation5], 1 }

</bundles_post_ra>
